<compile_context>
chip_gen: v5e
topology: v5e:2x2
jax: 0.10.0
libtpu: 0.0.40
codegen_flags: <defaults>
</compile_context>

<pallas_src>
import functools
from typing import Any, List, Literal, Union

import jax
import jax.numpy as jnp
from jax import lax
from jax.experimental import pallas as pl
from jax.experimental.pallas import tpu as pltpu


_MAX_CLONE_CHUNKS = 8            # max in-flight DMA descriptors per clone
_MIN_CHUNK_BYTES = 1 << 20       # keep each DMA chunk >= 1 MiB
_PALLAS_COPY_MIN_BYTES = 1 << 20  # below this, custom-call dispatch dominates


def _start_dma(copy):
    """Start a DMA at background priority when supported (recorder copies are
    not latency critical and should not compete with the model's own DMAs)."""
    try:
        copy.start(priority=1)
    except TypeError:
        # Older jax: AsyncCopyDescriptor.start() has no priority argument.
        copy.start()


# -----------------------------------------------------------------------------
# Pallas kernel: chunked HBM -> HBM DMA clone (zero compute, zero VMEM staging).
# Start all descriptors first, then wait on all of them (start-all/wait-all).
# -----------------------------------------------------------------------------
def _dma_clone_kernel(chunk_bounds, x_hbm, o_hbm, sems):
    copies = []
    for i in range(len(chunk_bounds) - 1):
        lo, hi = chunk_bounds[i], chunk_bounds[i + 1]
        cp = pltpu.make_async_copy(x_hbm.at[lo:hi], o_hbm.at[lo:hi], sems.at[i])
        _start_dma(cp)
        copies.append(cp)
    for cp in copies:
        cp.wait()


@functools.partial(jax.jit, static_argnames=("n_chunks",))
def _pallas_dma_clone(x: jax.Array, *, n_chunks: int) -> jax.Array:
    """Clone `x` via `n_chunks` concurrent HBM->HBM DMAs (no VMEM round trip)."""
    nbytes = int(x.size * jnp.dtype(x.dtype).itemsize)
    leading = x.shape[0]
    # Static, strictly increasing chunk boundaries along the leading dim.
    bounds = tuple((i * leading) // n_chunks for i in range(n_chunks + 1))
    return pl.pallas_call(
        functools.partial(_dma_clone_kernel, bounds),
        out_shape=jax.ShapeDtypeStruct(x.shape, x.dtype),
        in_specs=[pl.BlockSpec(memory_space=pl.ANY)],   # raw HBM ref, no auto-DMA
        out_specs=pl.BlockSpec(memory_space=pl.ANY),    # raw HBM ref, DMA target
        scratch_shapes=[pltpu.SemaphoreType.DMA((n_chunks,))],
        cost_estimate=pl.CostEstimate(
            flops=0, transcendentals=0, bytes_accessed=2 * nbytes
        ),
    )(x)


def _pallas_clone(x: jax.Array) -> jax.Array:
    """Pick a chunk count (>=1 MiB per chunk, capped at 8 and at the leading
    dim) and run the Pallas DMA clone."""
    if x.ndim == 0:
        return _pallas_dma_clone(x.reshape(1), n_chunks=1).reshape(())
    nbytes = int(x.size * jnp.dtype(x.dtype).itemsize)
    n_chunks = int(
        max(1, min(_MAX_CLONE_CHUNKS, x.shape[0], nbytes // _MIN_CHUNK_BYTES))
    )
    return _pallas_dma_clone(x, n_chunks=n_chunks)


@jax.jit
def _xla_copy(x: jax.Array) -> jax.Array:
    # Small-tensor forced-copy path: a plain XLA copy, no custom-call dispatch.
    return jnp.copy(x)


def _record_clone(
    x: jax.Array,
    *,
    force_copy: bool = False,
    copy_min_bytes: int = _PALLAS_COPY_MIN_BYTES,
) -> jax.Array:
    """Recorder hot path: 'detach' + (optionally) materialize a fresh copy."""
    x = lax.stop_gradient(x)  # torch .detach() equivalent
    if not force_copy:
        # JAX arrays are immutable: retaining x is already clone-equivalent.
        # (force_copy=True is the defense if the caller later donates x.)
        return x
    nbytes = int(x.size * jnp.dtype(x.dtype).itemsize)
    if nbytes < copy_min_bytes:
        return _xla_copy(x)
    return _pallas_clone(x)


# -----------------------------------------------------------------------------
# AttentionRecorder: same record_mode semantics as the PyTorch module.
# -----------------------------------------------------------------------------
class AttentionRecorder:
    """JAX/Pallas port of the PyTorch AttentionRecorder.

    forward(x) records a (zero-copy by default, DMA-cloned if force_copy=True)
    copy of `x` into self.data according to record_mode
    ("first" | "last" | "all") and returns None.
    """

    def __init__(
        self,
        name: str,
        record_mode: Literal["first", "last", "all"] = "first",
        *,
        force_copy: bool = False,
        copy_min_bytes: int = _PALLAS_COPY_MIN_BYTES,
    ):
        self.name = name
        self.record_mode = record_mode
        self.force_copy = force_copy
        self.copy_min_bytes = copy_min_bytes
        self._clear()
        self._forward_methods = {
            "all": self._forward_all,
            "last": self._forward_last,
            "first": self._forward_first,
        }

    def _clear(self):
        self.data: Union[List[Any], jax.Array, None] = None
        if self.record_mode == "all":
            self.data = []

    def get(self) -> Union[List[jax.Array], jax.Array, None]:
        # JAX arrays are immutable, so returning the stored arrays directly is
        # already clone-equivalent (no aliasing hazards like torch's .clone()).
        if isinstance(self.data, list):
            return list(self.data)
        elif isinstance(self.data, jax.Array):
            return self.data
        elif self.data is None:
            print(f"Warning, recorder data of layer {self.name} is empty, returning None.")
            return None
        else:
            raise TypeError(
                "Expected self.data to be of type list, jax.Array or None. "
                f"Got {type(self.data)} instead."
            )

    def _clone(self, x):
        return _record_clone(
            x, force_copy=self.force_copy, copy_min_bytes=self.copy_min_bytes
        )

    def forward(self, x):
        self._forward_methods[self.record_mode](x)

    __call__ = forward

    def _forward_all(self, x):
        assert isinstance(self.data, list) and isinstance(x, jax.Array)
        self.data.append(self._clone(x))

    def _forward_first(self, x):
        assert isinstance(x, jax.Array)
        if self.data is None:
            self.data = self._clone(x)

    def _forward_last(self, x):
        assert isinstance(x, jax.Array)
        self.data = self._clone(x)


if __name__ == "__main__":
    key = jax.random.PRNGKey(0)
    k1, k2 = jax.random.split(key)

    # NCHW input, as a PyTorch attention-map / activation tensor would be.
    x1 = jax.random.normal(k1, (2, 4, 16, 16), dtype=jnp.float32)
    x2 = jax.random.normal(k2, (2, 4, 16, 16), dtype=jnp.float32)

    # --- Exercise the Pallas DMA-clone kernel directly (single + multi chunk).
    y1 = jax.block_until_ready(_pallas_dma_clone(x1, n_chunks=1))
    assert jnp.array_equal(y1, x1)
    y2 = jax.block_until_ready(_pallas_dma_clone(x1, n_chunks=2))
    assert jnp.array_equal(y2, x1)

    # --- record_mode="first" (default zero-copy retain): first forward kept.
    rec_first = AttentionRecorder("attn_first", record_mode="first")
    rec_first(x1)
    rec_first(x2)
    d_first = jax.block_until_ready(rec_first.get())
    assert jnp.array_equal(d_first, x1)

    # --- record_mode="last": only the last forward is kept.
    rec_last = AttentionRecorder("attn_last", record_mode="last")
    rec_last(x1)
    rec_last(x2)
    d_last = jax.block_until_ready(rec_last.get())
    assert jnp.array_equal(d_last, x2)

    # --- record_mode="all": every forward kept, in order.
    rec_all = AttentionRecorder("attn_all", record_mode="all")
    rec_all(x1)
    rec_all(x2)
    d_all = rec_all.get()
    jax.block_until_ready(d_all)
    assert len(d_all) == 2
    assert jnp.array_equal(d_all[0], x1) and jnp.array_equal(d_all[1], x2)

    # --- force_copy=True with copy_min_bytes=0 drives the Pallas DMA path
    #     end-to-end through the recorder (bf16 checks the dtype-agnostic DMA;
    #     nothing is staged through VMEM/vregs, so no sublane tiling exists).
    xb = x1.astype(jnp.bfloat16)
    rec_copy = AttentionRecorder(
        "attn_forced_copy", record_mode="last", force_copy=True, copy_min_bytes=0
    )
    rec_copy(xb)
    db = jax.block_until_ready(rec_copy.get())
    assert jnp.array_equal(db, xb)

    # --- force_copy small-tensor fast path (plain XLA copy, no custom call).
    rec_small = AttentionRecorder("attn_small_copy", record_mode="last", force_copy=True)
    rec_small(x2)
    ds = jax.block_until_ready(rec_small.get())
    assert jnp.array_equal(ds, x2)

    # TODO(synk): the PyTorch `.detach().cpu()` host transfer has no in-kernel
    # equivalent; recorded copies stay on device (use jax.device_get to host).
    print("KERNEL_OK")
</pallas_src>

<mosaic_0001>
module attributes {stable_mosaic.version = 11 : i64} {
  func.func @_dma_clone_kernel(%arg0: memref<2x4x16x16xf32, #tpu.memory_space<any>>, %arg1: memref<2x4x16x16xf32, #tpu.memory_space<any>>, %arg2: memref<1x!tpu.dma_semaphore, #tpu.memory_space<semaphore_mem>>) attributes {dimension_semantics = [], scalar_prefetch = 0 : i64, scratch_operands = 1 : i64, tpu.core_type = #tpu.core_type<tc>} {
    %c0_i32 = arith.constant 0 : i32
    %c0_i32_0 = arith.constant 0 : i32
    %c0_i32_1 = arith.constant 0 : i32
    %c0_i32_2 = arith.constant 0 : i32
    %c0_i32_3 = arith.constant 0 : i32
    %0 = tpu.memref_slice %arg0[%c0_i32_0, %c0_i32_1, %c0_i32_2, %c0_i32_3] : memref<2x4x16x16xf32, #tpu.memory_space<any>> -> memref<2x4x16x16xf32, #tpu.memory_space<any>>
    %c0_i32_4 = arith.constant 0 : i32
    %c0_i32_5 = arith.constant 0 : i32
    %c0_i32_6 = arith.constant 0 : i32
    %c0_i32_7 = arith.constant 0 : i32
    %1 = tpu.memref_slice %arg1[%c0_i32_4, %c0_i32_5, %c0_i32_6, %c0_i32_7] : memref<2x4x16x16xf32, #tpu.memory_space<any>> -> memref<2x4x16x16xf32, #tpu.memory_space<any>>
    %2 = tpu.memref_slice %arg2[%c0_i32] : memref<1x!tpu.dma_semaphore, #tpu.memory_space<semaphore_mem>> -> memref<1x!tpu.dma_semaphore, #tpu.memory_space<semaphore_mem>>
    %3 = tpu.memref_squeeze %2 : memref<1x!tpu.dma_semaphore, #tpu.memory_space<semaphore_mem>> -> memref<!tpu.dma_semaphore, #tpu.memory_space<semaphore_mem>>
    tpu.enqueue_dma source(%0 : memref<2x4x16x16xf32, #tpu.memory_space<any>>) target(%1 : memref<2x4x16x16xf32, #tpu.memory_space<any>>) target_semaphore(%3 : memref<!tpu.dma_semaphore, #tpu.memory_space<semaphore_mem>>) {priority = 1 : i32}
    %c0_i32_8 = arith.constant 0 : i32
    %c0_i32_9 = arith.constant 0 : i32
    %c0_i32_10 = arith.constant 0 : i32
    %c0_i32_11 = arith.constant 0 : i32
    %c0_i32_12 = arith.constant 0 : i32
    %4 = tpu.memref_slice %arg0[%c0_i32_9, %c0_i32_10, %c0_i32_11, %c0_i32_12] : memref<2x4x16x16xf32, #tpu.memory_space<any>> -> memref<2x4x16x16xf32, #tpu.memory_space<any>>
    %c0_i32_13 = arith.constant 0 : i32
    %c0_i32_14 = arith.constant 0 : i32
    %c0_i32_15 = arith.constant 0 : i32
    %c0_i32_16 = arith.constant 0 : i32
    %5 = tpu.memref_slice %arg1[%c0_i32_13, %c0_i32_14, %c0_i32_15, %c0_i32_16] : memref<2x4x16x16xf32, #tpu.memory_space<any>> -> memref<2x4x16x16xf32, #tpu.memory_space<any>>
    %6 = tpu.memref_slice %arg2[%c0_i32_8] : memref<1x!tpu.dma_semaphore, #tpu.memory_space<semaphore_mem>> -> memref<1x!tpu.dma_semaphore, #tpu.memory_space<semaphore_mem>>
    %7 = tpu.memref_squeeze %6 : memref<1x!tpu.dma_semaphore, #tpu.memory_space<semaphore_mem>> -> memref<!tpu.dma_semaphore, #tpu.memory_space<semaphore_mem>>
    tpu.wait_dma2 semaphore(%7 : memref<!tpu.dma_semaphore, #tpu.memory_space<semaphore_mem>>) src(%4 : memref<2x4x16x16xf32, #tpu.memory_space<any>>) dst(%5 : memref<2x4x16x16xf32, #tpu.memory_space<any>>)
    return
  }
}

</mosaic_0001>

<bundles_post_ra>
// kernel: _pallas_dma_clone.1
= control target key start
LH: loop header
LB: loop body
LE: loop exit
PB: predicated region body
PF: predicated region fallthrough
CT: control target
= control target key end

     0   :  { %s34_s12 = smov [#allocation2]   ;;  %s35_s13 = smov [#allocation3]   ;;  %s53_s0 = inlined_call_operand.hbm [shape: f32[2,4,16,16], index: 0, kind: input, shape index: {}]   ;;  %s54_s1 = inlined_call_operand.hbm [shape: f32[2,4,16,16], index: 1, kind: output, shape index: {}]  }
   0x1   :  { %s10_s8 = sshll.u32 %s53_s0, 4  ;;  %s12_s11 = sshll.u32 %s54_s1, 4  ;;  %s11_s8 = int_to_ptr.hbm [resolvable:$true] %s10_s8  ;;  %s13_s11 = int_to_ptr.hbm [resolvable:$true] %s12_s11 }
   0x2   :  { %s36_s14 = smov 0  }
   0x3   :  { %16 = dma.general %s11_s8, 2048, %s13_s11, %s34_s12, %s35_s13, [#allocation4], %s36_s14, 0  }
   0x4   :  { %32 = dma.done.wait [#allocation2], 2048 }
   0x5   :  { %33 = vsyncadd [#allocation2], 4294965248 }
   0x6   :  { %22 = vsyncmov [#allocation2] }
   0x9   :  { %s23_s15 = vpop.sfrf %22 }
   0xa   :  { %p28_p0 = scmp.ne.s32.totalorder %s23_s15, 0 }
   0xc   :  { %27 = shalt.err (%p28_p0)  }

</bundles_post_ra>
